<compile_context>
chip_gen: v6e
topology: v6e:2x2x1
jax: 0.10.0
libtpu: 0.0.40
codegen_flags: <defaults>
</compile_context>

<pallas_src>
import math

import jax
import jax.numpy as jnp
from jax.experimental import pallas as pl
from jax.experimental.pallas import tpu as pltpu


# ~2 MiB per pipeline buffer; with 2x double-buffered input + output this is
# ~8 MiB of scoped VMEM — comfortably under every generation's default limit.
_MAX_BLOCK_BYTES = 2 * 1024 * 1024


def _copy_kernel(x_ref, o_ref):
    # Lane-dense 2D tile copy: both refs are (B, tile_n); plain unmasked vld/vst.
    o_ref[...] = x_ref[...]


def _choose_tile_n(b: int, numel: int, itemsize: int) -> int:
    """Largest legal last-dim tile that keeps one block under _MAX_BLOCK_BYTES."""
    if b * numel * itemsize <= _MAX_BLOCK_BYTES:
        # Whole flattened row fits in one block (last dim == full dim is always legal).
        return numel
    budget_lanes = _MAX_BLOCK_BYTES // (b * itemsize)
    tile_n = (budget_lanes // 128) * 128   # multiple of 128 -> legal partial-edge blocks
    return max(tile_n, 128)


def view_flatten(x: jnp.ndarray) -> jnp.ndarray:
    """Pallas implementation of View.forward: (B, *rest) -> (B, prod(rest))."""
    b = x.shape[0]
    numel = int(math.prod(x.shape[1:])) if x.ndim > 1 else 1
    itemsize = jnp.dtype(x.dtype).itemsize

    # Hoisted, metadata-only reshape: kernel sees a lane-dense (B, numel) slab
    # on both input and output sides.
    x_flat = x.reshape(b, numel)

    tile_n = _choose_tile_n(b, numel, itemsize)
    grid = (pl.cdiv(numel, tile_n),)

    return pl.pallas_call(
        _copy_kernel,
        out_shape=jax.ShapeDtypeStruct((b, numel), x.dtype),
        grid_spec=pl.GridSpec(
            grid=grid,
            # Block: full batch dim (== full array dim, legal for any dtype /
            # sublane packing) x a 128-multiple lane tile.
            in_specs=[pl.BlockSpec((b, tile_n), lambda i: (0, i))],
            out_specs=pl.BlockSpec((b, tile_n), lambda i: (0, i)),
        ),
        compiler_params=pltpu.CompilerParams(
            dimension_semantics=("parallel",),
        ),
        cost_estimate=pl.CostEstimate(
            flops=0,
            transcendentals=0,
            bytes_accessed=2 * x.size * itemsize,
        ),
        # Output is logically the same bytes as the (temporary) flattened input;
        # aliasing avoids a second full-size HBM allocation when this sits
        # inside a larger jit where x_flat is dead after the call.
        input_output_aliases={0: 0},
    )(x_flat)


if __name__ == "__main__":
    key = jax.random.PRNGKey(0)

    # 1) Small NCHW input consistent with a VQ-VAE feature map (single-block path).
    x = jax.random.normal(key, (2, 4, 16, 16), dtype=jnp.float32)
    y = jax.block_until_ready(view_flatten(x))
    ref = x.reshape(x.shape[0], -1)
    assert y.shape == (2, 4 * 16 * 16), y.shape
    assert y.dtype == x.dtype
    assert jnp.array_equal(y, ref)

    # 2) Larger input that exercises the multi-step pipelined grid (>1 block).
    k2 = jax.random.PRNGKey(1)
    x2 = jax.random.normal(k2, (2, 32, 128, 128), dtype=jnp.float32)
    y2 = jax.block_until_ready(view_flatten(x2))
    assert y2.shape == (2, 32 * 128 * 128), y2.shape
    assert jnp.array_equal(y2, x2.reshape(2, -1))

    # 3) bf16 path (sub-32-bit dtype; block sublane dim equals full batch dim, so
    #    packing constraints are satisfied by construction).
    x3 = jax.random.normal(jax.random.PRNGKey(2), (2, 4, 16, 16)).astype(jnp.bfloat16)
    y3 = jax.block_until_ready(view_flatten(x3))
    assert y3.shape == (2, 1024) and y3.dtype == jnp.bfloat16
    assert jnp.array_equal(y3, x3.reshape(2, -1))

    print("KERNEL_OK")
</pallas_src>

<mosaic_0001>
module attributes {stable_mosaic.version = 11 : i64} {
  func.func @_copy_kernel(%arg0: i32, %arg1: memref<2x1024xf32, #tpu.memory_space<vmem>>, %arg2: memref<2x1024xf32, #tpu.memory_space<vmem>>) attributes {dimension_semantics = [#tpu.dimension_semantics<parallel>], iteration_bounds = array<i64: 1>, scalar_prefetch = 0 : i64, scratch_operands = 0 : i64, tpu.core_type = #tpu.core_type<tc>, window_params = [{transform_indices = @transform_0, window_bounds = array<i64: 2, 1024>}, {transform_indices = @transform_1, window_bounds = array<i64: 2, 1024>}]} {
    %c0 = arith.constant 0 : index
    %c0_0 = arith.constant 0 : index
    %0 = vector.load %arg1[%c0, %c0_0] : memref<2x1024xf32, #tpu.memory_space<vmem>>, vector<2x1024xf32>
    %c0_1 = arith.constant 0 : index
    %c0_2 = arith.constant 0 : index
    %1 = vector.load %arg2[%c0_1, %c0_2] : memref<2x1024xf32, #tpu.memory_space<vmem>>, vector<2x1024xf32>
    tpu.vector_store %arg2[%c0_1, %c0_2], %0 {strides = array<i32>} : memref<2x1024xf32, #tpu.memory_space<vmem>>, vector<2x1024xf32>,
    return
  }
  func.func @transform_0(%arg0: i32) -> (i32, i32) {
    %c0_i32 = arith.constant 0 : i32
    %c0_i32_0 = arith.constant 0 : i32
    return %c0_i32, %arg0 : i32, i32
  }
  func.func @transform_1(%arg0: i32) -> (i32, i32) {
    %c0_i32 = arith.constant 0 : i32
    %c0_i32_0 = arith.constant 0 : i32
    return %c0_i32, %arg0 : i32, i32
  }
}

</mosaic_0001>

<bundles_post_ra>
// kernel: tpu_custom_call.1
= control target key start
LH: loop header
LB: loop body
LE: loop exit
PB: predicated region body
PF: predicated region fallthrough
CT: control target
= control target key end

     0   :  { %6 = vsyncpa [#allocation3], 0  ;;  %s104_s0 = inlined_call_operand.hbm [shape: f32[2,1024], index: 0, kind: input, shape index: {}, may-alias: {0,1}]   ;;  %s105_s1 = inlined_call_operand.hbm [shape: f32[2,1024], index: 1, kind: output, shape index: {}, may-alias: {0,1}]  }
   0x1   :  { %7 = vsyncpa [#allocation4], 0  ;;  %s86_s6 = smov [#allocation2]  }
   0x2   :  { %s14_s7 = sshll.u32 %s86_s6, 4  ;;  %s15_s7 = int_to_ptr.vmem [resolvable:$true] %s14_s7 }
   0x3   :  { %s50_s8 = scalar_lea.vmem %s15_s7, 256  ;;  %p55_p1 = scmp.lt.s32.totalorder %s15_s7, %s15_s7 }
   0x4   :  { %p51_p0 = scmp.ne.s32.totalorder %s15_s7, %s50_s8  ;;  %p56_p2 = scmp.lt.s32.totalorder %s50_s8, %s50_s8 }
   0x6   :  { %p57_p3 = por %p56_p2, %p55_p1 }
   0x8   :  { %p58_p4 = pnand %p57_p3, %p51_p0 }
   0xa   :  { %61 = shalt.err (!%p58_p4)
}
   0xb   :  { %17 = dma.hbm_to_vmem [thread:$0]  %s104_s0, 256, %s15_s7, [#allocation3]  }
   0xc   :  { %82 = dma.done.wait [#allocation3], 256  }
   0xd   :  { %83 = vsyncadd [#allocation3], 4294967040  ;;  %s87_s11 = smov [#allocation5]   ;;  %v21_v0 = vld [vmem:[#allocation2] sm:$0xff]  ;;  %v22_v1 = vld [vmem:[#allocation2 + $0x8] sm:$0xff] }
   0xe   :  { %s31_s12 = sshll.u32 %s87_s11, 4  ;;  %23 = vst [vmem:[#allocation5] sm:$0xff] %v21_v0  ;;  %24 = vst [vmem:[#allocation5 + $0x8] sm:$0xff] %v22_v1  ;;  %s32_s12 = int_to_ptr.vmem [resolvable:$true] %s31_s12 }
   0xf   :  { %s62_s13 = scalar_lea.vmem %s32_s12, 256  ;;  %p67_p6 = scmp.lt.s32.totalorder %s32_s12, %s32_s12 }
  0x10   :  { %p63_p5 = scmp.ne.s32.totalorder %s32_s12, %s62_s13  ;;  %p68_p7 = scmp.lt.s32.totalorder %s62_s13, %s62_s13 }
  0x12   :  { %p69_p8 = por %p68_p7, %p67_p6 }
  0x14   :  { %p70_p9 = pnand %p69_p8, %p63_p5 }
  0x16   :  { %73 = shalt.err (!%p70_p9)
}
  0x17   :  { %34 = dma.vmem_to_hbm [thread:$0]  %s32_s12, 256, %s105_s1, [#allocation4]  }
  0x18   :  { %84 = dma.done.wait [#allocation4], 256  }
  0x19   :  { %85 = vsyncadd [#allocation4], 4294967040 }
  0x1a   :  { %38 = vsyncpa [#allocation3], 1 }
  0x1b   :  { %39 = vsyncpa [#allocation4], 1 }

</bundles_post_ra>
